<compile_context>
chip_gen: v5e
topology: v5e:2x2
jax: 0.10.0
libtpu: 0.0.40
codegen_flags: <defaults>
</compile_context>

<pallas_src>
import functools

import jax
import jax.numpy as jnp
import numpy as np
from jax.experimental import pallas as pl
from jax.experimental.pallas import tpu as pltpu


def _gaussian_conditional_kernel(mu_ref, log_sigma_ref, eps_ref, o_ref, *, clip: bool):
    """Elementwise reparameterization: o = eps * exp(log_sigma) + mu."""
    log_sigma = log_sigma_ref[...]
    if clip:
        log_sigma = jnp.minimum(log_sigma, jnp.asarray(10.0, log_sigma.dtype))
    # exp() runs on the EUP (free slot under the HBM bottleneck); mul/add are VPU filler.
    o_ref[...] = eps_ref[...] * jnp.exp(log_sigma) + mu_ref[...]


def _pick_tile(extent: int, preferred: int, unit: int) -> int:
    """Largest tile <= preferred that is the full extent or a `unit`-aligned divisor of it."""
    if extent <= preferred:
        return extent
    t = (preferred // unit) * unit
    while t >= unit:
        if extent % t == 0:
            return t
        t -= unit
    return extent  # fall back: single full-extent block along this axis


def gaussian_conditional(x, eps, dim, *, clip=False, max_tile_b=256, max_tile_d=2048):
    """x: (B, 2*dim) float32, eps: (B, dim) float32 -> (B, dim) float32."""
    B, two_dim = x.shape
    assert two_dim == 2 * dim, "input channel axis must be 2*dim ([mu | log_sigma])"
    assert eps.shape == (B, dim)

    # Large 2-D tiles: batch axis in multiples of 8 (sublanes), channel axis in
    # multiples of 128 (lanes); clamp to the full extent for small problems.
    tile_b = _pick_tile(B, max_tile_b, 8)
    tile_d = _pick_tile(dim, max_tile_d, 128)

    n_b = B // tile_b
    n_d = dim // tile_d
    dim_blocks = n_d  # block offset of the log_sigma half inside x along the lane axis

    kernel = functools.partial(_gaussian_conditional_kernel, clip=clip)

    itemsize = jnp.dtype(x.dtype).itemsize
    tile_bytes = tile_b * tile_d * itemsize
    # 4 streams (mu, log_sigma, eps, out) x 2 pipeline buffers each, plus headroom.
    vmem_needed = 8 * tile_bytes
    vmem_limit = min(int(vmem_needed * 1.5) + (2 << 20), 96 << 20)

    cost = pl.CostEstimate(
        flops=3 * B * dim,                       # mul + add (+ min on the clip path)
        transcendentals=B * dim,                 # one exp per output element
        bytes_accessed=4 * B * dim * itemsize,   # mu + log_sigma + eps in, out
    )

    return pl.pallas_call(
        kernel,
        out_shape=jax.ShapeDtypeStruct((B, dim), x.dtype),
        grid_spec=pltpu.PrefetchScalarGridSpec(
            num_scalar_prefetch=0,
            grid=(n_b, n_d),
            in_specs=[
                # mu half of x: lane blocks [0, n_d)
                pl.BlockSpec((tile_b, tile_d), lambda i, j: (i, j)),
                # log_sigma half of x: lane blocks [n_d, 2*n_d)
                pl.BlockSpec((tile_b, tile_d), lambda i, j: (i, j + dim_blocks)),
                # noise
                pl.BlockSpec((tile_b, tile_d), lambda i, j: (i, j)),
            ],
            out_specs=pl.BlockSpec((tile_b, tile_d), lambda i, j: (i, j)),
        ),
        compiler_params=pltpu.CompilerParams(
            dimension_semantics=("parallel", "parallel"),
            vmem_limit_bytes=vmem_limit,
        ),
        cost_estimate=cost,
    )(x, x, eps)


def gaussian_conditional_ref(x, eps, dim, *, clip=False):
    """Pure-JAX reference mirroring the PyTorch forward."""
    mu = x[:, :dim]
    log_sigma = x[:, dim:2 * dim]
    if clip:
        log_sigma = jnp.minimum(log_sigma, 10.0)
    return eps * jnp.exp(log_sigma) + mu


if __name__ == "__main__":
    B, DIM = 8, 256  # small, TPU-tile-friendly shapes

    key = jax.random.PRNGKey(0)
    kx, keps = jax.random.split(key)

    # Deterministic synthetic "pre-activation" input (B, 2*dim) = [mu | log_sigma].
    x = jax.random.normal(kx, (B, 2 * DIM), dtype=jnp.float32)
    # Deterministic stand-in for input.data.new(B, dim).normal_().
    eps = jax.random.normal(keps, (B, DIM), dtype=jnp.float32)

    out = gaussian_conditional(x, eps, DIM, clip=False)
    out = jax.block_until_ready(out)
    ref = gaussian_conditional_ref(x, eps, DIM, clip=False)
    np.testing.assert_allclose(np.asarray(out), np.asarray(ref), rtol=1e-6, atol=1e-6)

    # Also check the clip=True code path.
    out_clip = jax.block_until_ready(gaussian_conditional(x, eps, DIM, clip=True))
    ref_clip = gaussian_conditional_ref(x, eps, DIM, clip=True)
    np.testing.assert_allclose(np.asarray(out_clip), np.asarray(ref_clip), rtol=1e-6, atol=1e-6)

    print("KERNEL_OK")
</pallas_src>

<mosaic_0001>
module attributes {stable_mosaic.version = 11 : i64} {
  func.func @_gaussian_conditional_kernel(%arg0: i32, %arg1: i32, %arg2: memref<8x256xf32, #tpu.memory_space<vmem>>, %arg3: memref<8x256xf32, #tpu.memory_space<vmem>>, %arg4: memref<8x256xf32, #tpu.memory_space<vmem>>, %arg5: memref<8x256xf32, #tpu.memory_space<vmem>>) attributes {dimension_semantics = [#tpu.dimension_semantics<parallel>, #tpu.dimension_semantics<parallel>], iteration_bounds = array<i64: 1, 1>, scalar_prefetch = 0 : i64, scratch_operands = 0 : i64, tpu.core_type = #tpu.core_type<tc>, window_params = [{transform_indices = @transform_0, window_bounds = array<i64: 8, 256>}, {transform_indices = @transform_1, window_bounds = array<i64: 8, 256>}, {transform_indices = @transform_2, window_bounds = array<i64: 8, 256>}, {transform_indices = @transform_3, window_bounds = array<i64: 8, 256>}]} {
    %c0 = arith.constant 0 : index
    %c0_0 = arith.constant 0 : index
    %0 = vector.load %arg3[%c0, %c0_0] : memref<8x256xf32, #tpu.memory_space<vmem>>, vector<8x256xf32>
    %c0_1 = arith.constant 0 : index
    %c0_2 = arith.constant 0 : index
    %1 = vector.load %arg4[%c0_1, %c0_2] : memref<8x256xf32, #tpu.memory_space<vmem>>, vector<8x256xf32>
    %2 = math.exp %0 : vector<8x256xf32>
    %3 = arith.mulf %1, %2 : vector<8x256xf32>
    %c0_3 = arith.constant 0 : index
    %c0_4 = arith.constant 0 : index
    %4 = vector.load %arg2[%c0_3, %c0_4] : memref<8x256xf32, #tpu.memory_space<vmem>>, vector<8x256xf32>
    %5 = arith.addf %3, %4 : vector<8x256xf32>
    %c0_5 = arith.constant 0 : index
    %c0_6 = arith.constant 0 : index
    %6 = vector.load %arg5[%c0_5, %c0_6] : memref<8x256xf32, #tpu.memory_space<vmem>>, vector<8x256xf32>
    tpu.vector_store %arg5[%c0_5, %c0_6], %5 {strides = array<i32>} : memref<8x256xf32, #tpu.memory_space<vmem>>, vector<8x256xf32>,
    return
  }
  func.func @transform_0(%arg0: i32, %arg1: i32) -> (i32, i32) {
    %c0_i32 = arith.constant 0 : i32
    return %arg0, %arg1 : i32, i32
  }
  func.func @transform_1(%arg0: i32, %arg1: i32) -> (i32, i32) {
    %c1_i32 = arith.constant 1 : i32
    %0 = arith.addi %arg1, %c1_i32 : i32
    %c0_i32 = arith.constant 0 : i32
    return %arg0, %0 : i32, i32
  }
  func.func @transform_2(%arg0: i32, %arg1: i32) -> (i32, i32) {
    %c0_i32 = arith.constant 0 : i32
    return %arg0, %arg1 : i32, i32
  }
  func.func @transform_3(%arg0: i32, %arg1: i32) -> (i32, i32) {
    %c0_i32 = arith.constant 0 : i32
    return %arg0, %arg1 : i32, i32
  }
}

</mosaic_0001>

<bundles_post_ra>
// kernel: tpu_custom_call.1
= control target key start
LH: loop header
LB: loop body
LE: loop exit
PB: predicated region body
PF: predicated region fallthrough
CT: control target
= control target key end

     0   :  { %8 = vsyncpa [#allocation3], 0  ;;  %s243_s0 = inlined_call_operand.hbm [shape: f32[8,512], index: 0, kind: input, shape index: {}]   ;;  %s244_s1 = inlined_call_operand.hbm [shape: f32[8,512], index: 1, kind: input, shape index: {}]   ;;  %s245_s2 = inlined_call_operand.hbm [shape: f32[8,256], index: 2, kind: input, shape index: {}]   ;;  %s246_s3 = inlined_call_operand.hbm [shape: f32[8,256], index: 3, kind: output, shape index: {}]  }
   0x1   :  { %9 = vsyncpa [#allocation6], 0  ;;  %s96_s14 = scalar_lea.hbm %s244_s1, 16 }
   0x2   :  { %10 = vsyncpa [#allocation4], 0  ;;  %s31_s15 = sshll.u32 %s96_s14, 4  ;;  %s207_s16 = smov [#allocation5]   ;;  %s32_s15 = int_to_ptr.hbm [resolvable:$true] %s31_s15 }
   0x3   :  { %s33_s17 = sshll.u32 %s207_s16, 4  ;;  %s16_s20 = sshll.u32 %s243_s0, 4  ;;  %s34_s17 = int_to_ptr.vmem [resolvable:$true] %s33_s17  ;;  %s17_s20 = int_to_ptr.hbm [resolvable:$true] %s16_s20 }
   0x4   :  { %36 = dma.hbm_to_vmem [thread:$0]  %s32_s15, 256, %s34_s17, [#allocation6]  }
   0x5   :  { %s208_s21 = smov [#allocation2]   ;;  %s42_s25 = sshll.u32 %s245_s2, 4  ;;  %s43_s25 = int_to_ptr.hbm [resolvable:$true] %s42_s25 }
   0x6   :  { %s18_s22 = sshll.u32 %s208_s21, 4  ;;  %s209_s1 = smov [#allocation7]   ;;  %s19_s22 = int_to_ptr.vmem [resolvable:$true] %s18_s22 }
   0x7   :  { %21 = dma.hbm_to_vmem [thread:$0]  %s17_s20, 256, %s19_s22, [#allocation3]  }
   0x8   :  { %s44_s26 = sshll.u32 %s209_s1, 4  ;;  %s45_s26 = int_to_ptr.vmem [resolvable:$true] %s44_s26 }
   0x9   :  { %47 = dma.hbm_to_vmem [thread:$0]  %s43_s25, 256, %s45_s26, [#allocation6]  }
   0xa   :  { %201 = dma.done.wait [#allocation3], 256  }
   0xb   :  { %202 = vsyncadd [#allocation3], 4294967040 }
   0xc   :  { %203 = dma.done.wait [#allocation6], 512  }
   0xd   :  { %204 = vsyncadd [#allocation6], 4294966784  ;;  %v62_v0 = vld [vmem:[#allocation5] sm:$0xff]  ;;  %v63_v2 = vld [vmem:[#allocation5 + $0x8] sm:$0xff]  ;;  %s210_s0 = smov [#allocation8]   ;;  %s85_s29 = sshll.u32 %s246_s3, 4  ;;  %s86_s29 = int_to_ptr.hbm [resolvable:$true] %s85_s29 }
   0xe   :  { %v66_v1 = vmul.f32 1.442695, %v62_v0  ;;  %v68_v3 = vmul.f32 1.442695, %v63_v2  ;;  %v64_v4 = vld [vmem:[#allocation7] sm:$0xff]  ;;  %v65_v5 = vld [vmem:[#allocation7 + $0x8] sm:$0xff] }
   0xf   :  { %v72_v7 = vld [vmem:[#allocation2] sm:$0xff]  ;;  %v73_v10 = vld [vmem:[#allocation2 + $0x8] sm:$0xff]  ;;  %s83_s2 = sshll.u32 %s210_s0, 4  ;;  %s84_s2 = int_to_ptr.vmem [resolvable:$true] %s83_s2 }
  0x10   :  { %101 = vpow2.f32 %v66_v1 }
  0x11   :  { %103 = vpow2.f32 %v68_v3 }
  0x16   :  { %v102_v6 = vpop.eup %101 }
  0x17   :  { %v104_v8 = vpop.eup %103  ;;  %v70_v9 = vmul.f32 %v102_v6, %v64_v4 }
  0x18   :  { %v71_v11 = vmul.f32 %v104_v8, %v65_v5 }
  0x19   :  { %v74_v12 = vadd.f32 %v72_v7, %v70_v9 }
  0x1a   :  { %v75_v13 = vadd.f32 %v73_v10, %v71_v11 }
  0x1b   :  { %76 = vst [vmem:[#allocation8] sm:$0xff] %v74_v12 }
  0x1c   :  { %77 = vst [vmem:[#allocation8 + $0x8] sm:$0xff] %v75_v13 }
  0x1d   :  { %88 = dma.vmem_to_hbm [thread:$0]  %s84_s2, 256, %s86_s29, [#allocation4]  }
  0x1e   :  { %205 = dma.done.wait [#allocation4], 256  }
  0x1f   :  { %206 = vsyncadd [#allocation4], 4294967040 }
  0x20   :  { %93 = vsyncpa [#allocation3], 1 }
  0x21   :  { %94 = vsyncpa [#allocation6], 1 }
  0x22   :  { %95 = vsyncpa [#allocation4], 1 }

</bundles_post_ra>
